<compile_context>
chip_gen: v6e
topology: v6e:2x2x1
jax: 0.10.0
libtpu: 0.0.40
codegen_flags: <defaults>
</compile_context>

<pallas_src>
import math

import numpy as np
import jax
import jax.numpy as jnp
from jax.experimental import pallas as pl
from jax.experimental.pallas import tpu as pltpu

_SMALL_BYTES = 1 << 20           # below this, plain XLA reshape+sum wins
_TARGET_GRID_STEPS = 8           # keep >= 8 steps so both v7x TCs get work
_MAX_OUT_LANES_BF16 = 256        # MXU output tile width for bf16 operands
_MAX_OUT_LANES_F32 = 128         # f32 HIGHEST matmul is multi-pass: keep small


# ---------------------------------------------------------------------------
# Small helpers.
# ---------------------------------------------------------------------------
def _cdiv(a: int, b: int) -> int:
    return -(-a // b)


def _round_up(x: int, m: int) -> int:
    return _cdiv(x, m) * m


def _round_down(x: int, m: int) -> int:
    return (x // m) * m


def _sublane_multiple(itemsize: int) -> int:
    # f32 -> 8, bf16 -> 16, int8/fp8 -> 32 (packed-sublane layouts).
    return max(8, 32 // max(1, itemsize))


_BUDGETS = None


def _budgets():
    """(vmem_limit_bytes, per-input-block byte budget), per TPU generation."""
    global _BUDGETS
    if _BUDGETS is None:
        vmem_phys = 0
        try:
            vmem_phys = int(pltpu.get_tpu_info().vmem_capacity_bytes)
        except Exception:
            vmem_phys = 0
        if vmem_phys >= 96 * 1024 * 1024:          # v5e / v6e: 128 MiB VMEM
            _BUDGETS = (64 * 1024 * 1024, 8 * 1024 * 1024)
        else:                                       # v7x (64 MiB) or unknown
            _BUDGETS = (32 * 1024 * 1024, 4 * 1024 * 1024)
    return _BUDGETS


def _pick_row_tile(rows_out: int, rows_in_per_out: int, lanes: int,
                   itemsize: int, in_block_bytes: int) -> int:
    """Output-row tile: dtype-aligned, within the per-block budget, and small
    enough to leave >= _TARGET_GRID_STEPS grid steps when the array allows."""
    sub = _sublane_multiple(itemsize)
    budget = in_block_bytes // max(1, lanes * itemsize * rows_in_per_out)
    budget = max(sub, _round_down(budget, sub))
    steps_cap = max(sub, _round_up(_cdiv(rows_out, _TARGET_GRID_STEPS), sub))
    full = _round_up(rows_out, sub)
    return min(budget, steps_cap, full)


# ---------------------------------------------------------------------------
# Path A: fold along the sublane axis (trailing block is lane-dense).
# ---------------------------------------------------------------------------
def _sublane_fold_kernel(factor: int, rows_out: int):
    # TODO(synk): if a bundle audit shows the strided slices expand to
    # per-sublane vlds on v7x, switch to one contiguous load + XLU reduction.
    def kernel(x_ref, o_ref):
        acc = x_ref[pl.ds(0, rows_out, stride=factor), :]
        for i in range(1, factor):           # static -> unrolls at trace time
            acc = acc + x_ref[pl.ds(i, rows_out, stride=factor), :]
        o_ref[...] = acc
    return kernel


def _fold_sublane(x2: jax.Array, factor: int,
                  vmem_limit: int, in_block_bytes: int) -> jax.Array:
    """x2: (M, S). Sums groups of `factor` consecutive rows -> (M//factor, S)."""
    m, s = x2.shape
    m_out = m // factor
    itemsize = x2.dtype.itemsize
    sub = _sublane_multiple(itemsize)

    # Lane-axis tile: only split when even a minimal row block would blow the
    # budget (e.g. axis<=1 folds where trail = C*R*L or R*L is very large).
    min_rows_in = sub * factor
    if s <= 128 or min_rows_in * s * itemsize <= in_block_bytes:
        s_tile = s
    else:
        s_tile = _round_down(in_block_bytes // (min_rows_in * itemsize), 128)
        s_tile = max(128, min(s_tile, _round_down(s, 128)))
    n_col = _cdiv(s, s_tile)

    tile_out = _pick_row_tile(m_out, factor, s_tile, itemsize, in_block_bytes)
    n_row = _cdiv(m_out, tile_out)            # edge blocks are masked by Pallas

    return pl.pallas_call(
        _sublane_fold_kernel(factor, tile_out),
        out_shape=jax.ShapeDtypeStruct((m_out, s), x2.dtype),
        grid_spec=pltpu.PrefetchScalarGridSpec(
            num_scalar_prefetch=0,
            grid=(n_row, n_col),
            in_specs=[pl.BlockSpec((tile_out * factor, s_tile),
                                   lambda i, j: (i, j))],
            out_specs=pl.BlockSpec((tile_out, s_tile), lambda i, j: (i, j)),
        ),
        compiler_params=pltpu.CompilerParams(
            dimension_semantics=("parallel", "parallel"),
            vmem_limit_bytes=vmem_limit,
        ),
    )(x2)


# ---------------------------------------------------------------------------
# Path B: fold along the lane axis with a static 0/1 fold matrix on the MXU.
# ---------------------------------------------------------------------------
def _lane_fold_kernel(op_dtype, precision, needs_cast: bool):
    def kernel(x_ref, f_ref, o_ref):
        x = x_ref[...]
        if needs_cast:
            x = x.astype(op_dtype)
        acc = jnp.dot(x, f_ref[...],
                      preferred_element_type=jnp.float32,
                      precision=precision)
        o_ref[...] = acc.astype(o_ref.dtype)
    return kernel


def _pick_row_group(lead: int, out_cols: int, max_out_lanes: int) -> int:
    """Merge r leading rows onto the lane axis so output stores are lane-dense."""
    if out_cols >= 128:
        return 1
    max_r = max(1, max_out_lanes // out_cols)
    for r in range(max_r, 1, -1):               # prefer 128-aligned output width
        if lead % r == 0 and (r * out_cols) % 128 == 0:
            return r
    for r in range(max_r, 1, -1):               # otherwise: as wide as possible
        if lead % r == 0:
            return r
    return 1


def _pick_group_tile(a_out: int, chunk: int, max_out_lanes: int):
    """Output fold-groups per column tile, or None if no lane-dense tiling."""
    if a_out * chunk <= max_out_lanes:
        return a_out                             # full width, no column tiling
    g_cap = max(1, max_out_lanes // chunk)
    for g in range(g_cap, 0, -1):
        if a_out % g == 0 and (g * chunk) % 128 == 0:
            return g
    return None


def _fold_lane(x2: jax.Array, factor: int, chunk: int, g: int,
               vmem_limit: int, in_block_bytes: int) -> jax.Array:
    """x2: (P, A*chunk). Sums groups of `factor` consecutive chunks per row."""
    p, cols = x2.shape
    a_out = cols // (factor * chunk)
    cols_out_blk = g * chunk
    cols_in_blk = g * factor * chunk
    itemsize = x2.dtype.itemsize

    if x2.dtype == jnp.bfloat16:
        # 0/1 fold matrix is exact in bf16; bf16 x bf16 -> f32 acc is exact and
        # runs at native MXU rate with half the VMEM/vreg footprint.
        op_dtype, precision = jnp.bfloat16, jax.lax.Precision.DEFAULT
    else:
        # f32 (and other) inputs: keep exact HIGHEST-precision accumulation;
        # the 128-lane output cap keeps the multi-pass matmul under the DMA.
        op_dtype, precision = jnp.float32, jax.lax.Precision.HIGHEST
    needs_cast = (x2.dtype != jnp.dtype(op_dtype))

    tile_p = _pick_row_tile(p, 1, cols_in_blk, itemsize, in_block_bytes)
    grid = (_cdiv(p, tile_p), a_out // g)        # row edge blocks masked

    # Static fold matrix: F = kron(I_g, [I_chunk; I_chunk; ... factor times]).
    fold_block = np.tile(np.eye(chunk, dtype=np.float32), (factor, 1))
    fmat = jnp.asarray(np.kron(np.eye(g, dtype=np.float32), fold_block),
                       dtype=op_dtype)

    return pl.pallas_call(
        _lane_fold_kernel(op_dtype, precision, needs_cast),
        out_shape=jax.ShapeDtypeStruct((p, a_out * chunk), x2.dtype),
        grid_spec=pltpu.PrefetchScalarGridSpec(
            num_scalar_prefetch=0,
            grid=grid,
            in_specs=[
                pl.BlockSpec((tile_p, cols_in_blk), lambda i, j: (i, j)),
                # constant block index -> fetched once, stays VMEM-resident
                pl.BlockSpec((cols_in_blk, cols_out_blk), lambda i, j: (0, 0)),
            ],
            out_specs=pl.BlockSpec((tile_p, cols_out_blk), lambda i, j: (i, j)),
        ),
        compiler_params=pltpu.CompilerParams(
            dimension_semantics=("parallel", "parallel"),
            vmem_limit_bytes=vmem_limit,
        ),
    )(x2, fmat)


# ---------------------------------------------------------------------------
# Public wrapper (same semantics as Fold(factor, axis).forward).
# ---------------------------------------------------------------------------
def fold(x: jax.Array, factor: int = 2, axis: int = 2, *,
         force_pallas: bool = False) -> jax.Array:
    if x.ndim != 4:
        raise ValueError(
            f"Expected Tensor of dimension 4, got Tensor of dimension {x.ndim}")
    if not axis < x.ndim:
        raise IndexError(
            f"Axis {axis} outside the range for Tensor with dimension {x.ndim}")
    if axis < 0:
        axis += x.ndim
    if x.shape[axis] % factor != 0:
        raise ValueError(
            f"Axis {axis} of size {x.shape[axis]} is not divisible by {factor}")
    if factor == 1:
        return x

    shape = x.shape
    out_shape = tuple(d // factor if i == axis else d
                      for i, d in enumerate(shape))
    a = shape[axis]
    lead = math.prod(shape[:axis])
    trail = math.prod(shape[axis + 1:])

    # Tiny arrays: pallas_call launch overhead dominates; let XLA fuse it.
    if (x.size * x.dtype.itemsize) < _SMALL_BYTES and not force_pallas:
        folded = x.reshape(shape[:axis] + (a // factor, factor) + shape[axis + 1:])
        return jnp.sum(folded, axis=axis + 1).astype(x.dtype)

    vmem_limit, in_block = _budgets()

    if trail >= 128:
        # Fold axis merged with all leading dims onto the sublane axis; the
        # contiguous trailing dims stay on the (lane-dense) last axis.
        out2 = _fold_sublane(x.reshape(lead * a, trail), factor,
                             vmem_limit, in_block)
        return out2.reshape(out_shape)

    # Lane-axis (MXU fold-matrix) path for small trailing blocks / axis=3.
    a_out = a // factor
    out_cols = a_out * trail
    max_out_lanes = (_MAX_OUT_LANES_BF16 if x.dtype == jnp.bfloat16
                     else _MAX_OUT_LANES_F32)

    # Narrow output: merge r leading rows onto the lane axis (free reshape) so
    # output stores are >=128-lane dense instead of masked vst.msk per row.
    r = _pick_row_group(lead, out_cols, max_out_lanes)
    p = lead // r
    a_out_r = r * a_out

    g = _pick_group_tile(a_out_r, trail, max_out_lanes)
    if g is not None:
        out2 = _fold_lane(x.reshape(p, r * a * trail), factor, trail, g,
                          vmem_limit, in_block)
    else:
        # Rare shapes with no lane-dense column tiling: still correct,
        # just lane-sparse (masked stores).
        out2 = _fold_sublane(x.reshape(lead * a, trail), factor,
                             vmem_limit, in_block)
    return out2.reshape(out_shape)


# ---------------------------------------------------------------------------
# Self-test
# ---------------------------------------------------------------------------
def _ref_fold(x, factor, axis):
    slices = []
    for i in range(factor):
        sl = [slice(None)] * 4
        sl[axis] = slice(i, None, factor)
        slices.append(tuple(sl))
    y = x[slices[0]]
    for i in range(1, factor):
        y = y + x[slices[i]]
    return y


def _check(y, r, name):
    assert y.shape == r.shape, f"{name}: shape {y.shape} vs {r.shape}"
    ok = jnp.allclose(y.astype(jnp.float32), r.astype(jnp.float32), atol=1e-6)
    assert ok, f"mismatch ({name})"


if __name__ == "__main__":
    key = jax.random.PRNGKey(0)
    k1, k2, k3, k4, k5, k6 = jax.random.split(key, 6)

    # 1) Default Fold(factor=2, axis=2) on (B, C, R, L) = (2, 4, 16, 16).
    #    Tiny input -> XLA fallback; forced -> MXU lane path (f32, HIGHEST).
    x1 = jax.random.randint(k1, (2, 4, 16, 16), -8, 8).astype(jnp.float32)
    r1 = _ref_fold(x1, 2, 2)
    _check(jax.block_until_ready(fold(x1, 2, 2)), r1, "tiny/xla f2 a2")
    _check(jax.block_until_ready(fold(x1, 2, 2, force_pallas=True)),
           r1, "lane f32 f2 a2")

    # 2) factor=4 fold along the lane axis (axis=3) with narrow output:
    #    exercises the row-regrouping (kron(I_r, F)) lane-dense store path.
    x2 = jax.random.randint(k2, (2, 4, 8, 16), -8, 8).astype(jnp.float32)
    y2 = jax.block_until_ready(fold(x2, 4, 3, force_pallas=True))
    _check(y2, _ref_fold(x2, 4, 3), "lane f32 regroup f4 a3")

    # 3) Lane-dense trailing dim (L=128) -> strided-sublane path.
    x3 = jax.random.normal(k3, (2, 4, 16, 128), dtype=jnp.float32)
    y3 = jax.block_until_ready(fold(x3, 2, 2, force_pallas=True))
    _check(y3, _ref_fold(x3, 2, 2), "sublane f2 a2 L=128")

    # 4) Fold along the channel axis (axis=1); trailing block R*L = 256 lanes.
    x4 = jax.random.normal(k4, (2, 4, 8, 32), dtype=jnp.float32)
    y4 = jax.block_until_ready(fold(x4, 2, 1, force_pallas=True))
    _check(y4, _ref_fold(x4, 2, 1), "sublane f2 a1")

    # 5) bf16 input, small trailing dim -> bf16 MXU lane path (default precision).
    x5 = jax.random.randint(k5, (4, 8, 64, 32), -8, 8).astype(jnp.bfloat16)
    y5 = jax.block_until_ready(fold(x5, 2, 2, force_pallas=True))
    _check(y5, _ref_fold(x5, 2, 2), "lane bf16 f2 a2")

    # 6) Moderate (4 MiB) f32 input dispatched normally -> tiled sublane path.
    x6 = jax.random.normal(k6, (2, 8, 512, 128), dtype=jnp.float32)
    y6 = jax.block_until_ready(fold(x6, 2, 2))
    _check(y6, _ref_fold(x6, 2, 2), "sublane moderate f2 a2")

    print("KERNEL_OK")
</pallas_src>

<mosaic_0001>
module attributes {stable_mosaic.version = 11 : i64} {
  func.func @kernel(%arg0: i32, %arg1: i32, %arg2: memref<8x256xf32, #tpu.memory_space<vmem>>, %arg3: memref<256x128xf32, #tpu.memory_space<vmem>>, %arg4: memref<8x128xf32, #tpu.memory_space<vmem>>) attributes {dimension_semantics = [#tpu.dimension_semantics<parallel>, #tpu.dimension_semantics<parallel>], iteration_bounds = array<i64: 1, 1>, scalar_prefetch = 0 : i64, scratch_operands = 0 : i64, tpu.core_type = #tpu.core_type<tc>, window_params = [{transform_indices = @transform_0, window_bounds = array<i64: 8, 256>}, {pipeline_mode = #tpu.pipeline_mode<synchronous>, transform_indices = @transform_1, window_bounds = array<i64: 256, 128>}, {transform_indices = @transform_2, window_bounds = array<i64: 8, 128>}]} {
    %c0 = arith.constant 0 : index
    %c0_0 = arith.constant 0 : index
    %0 = vector.load %arg2[%c0, %c0_0] : memref<8x256xf32, #tpu.memory_space<vmem>>, vector<8x256xf32>
    %c0_1 = arith.constant 0 : index
    %c0_2 = arith.constant 0 : index
    %1 = vector.load %arg3[%c0_1, %c0_2] : memref<256x128xf32, #tpu.memory_space<vmem>>, vector<256x128xf32>
    %cst = arith.constant dense<0.000000e+00> : vector<8x128xf32>
    %2 = tpu.matmul %0, %1, %cst {dimension_numbers = #tpu.dot_dimension_numbers<[1], [0], [0], [1], [0, 0, 1, 1], [], []>, precision = #tpu.contract_precision<fp32>} : vector<8x256xf32>, vector<256x128xf32>, vector<8x128xf32> -> vector<8x128xf32>
    %c0_3 = arith.constant 0 : index
    %c0_4 = arith.constant 0 : index
    %3 = vector.load %arg4[%c0_3, %c0_4] : memref<8x128xf32, #tpu.memory_space<vmem>>, vector<8x128xf32>
    tpu.vector_store %arg4[%c0_3, %c0_4], %2 {strides = array<i32>} : memref<8x128xf32, #tpu.memory_space<vmem>>, vector<8x128xf32>,
    return
  }
  func.func @transform_0(%arg0: i32, %arg1: i32) -> (i32, i32) {
    %c0_i32 = arith.constant 0 : i32
    return %arg0, %arg1 : i32, i32
  }
  func.func @transform_1(%arg0: i32, %arg1: i32) -> (i32, i32) {
    %c0_i32 = arith.constant 0 : i32
    %c0_i32_0 = arith.constant 0 : i32
    %c0_i32_1 = arith.constant 0 : i32
    return %c0_i32, %c0_i32_0 : i32, i32
  }
  func.func @transform_2(%arg0: i32, %arg1: i32) -> (i32, i32) {
    %c0_i32 = arith.constant 0 : i32
    return %arg0, %arg1 : i32, i32
  }
}

</mosaic_0001>

<bundles_post_ra>
// kernel: tpu_custom_call.1
= control target key start
LH: loop header
LB: loop body
LE: loop exit
PB: predicated region body
PF: predicated region fallthrough
CT: control target
= control target key end

     0   :  { %7 = vsyncpa [#allocation3], 0  ;;  %s1863_s0 = inlined_call_operand.hbm [shape: f32[8,256], index: 0, kind: input, shape index: {}]   ;;  %s1864_s1 = inlined_call_operand.hbm [shape: f32[256,128], index: 1, kind: input, shape index: {}]   ;;  %s1865_s2 = inlined_call_operand.hbm [shape: f32[8,128], index: 2, kind: output, shape index: {}]  }
   0x1   :  { %8 = vsyncpa [#allocation6], 0 }
   0x2   :  { %9 = vsyncpa [#allocation4], 0  ;;  %s1232_s9 = smov [#allocation2]   ;;  %s1233_s11 = smov [#allocation5]  }
   0x3   :  { %s16_s10 = sshll.u32 %s1232_s9, 4  ;;  %s25_s12 = sshll.u32 %s1233_s11, 4  ;;  %s17_s10 = int_to_ptr.vmem [resolvable:$true] %s16_s10  ;;  %s26_s12 = int_to_ptr.vmem [resolvable:$true] %s25_s12 }
   0x4   :  { %s1174_s13 = scalar_lea.vmem %s17_s10, 256  ;;  %p1179_p1 = scmp.lt.s32.totalorder %s17_s10, %s17_s10 }
   0x5   :  { %p1175_p0 = scmp.ne.s32.totalorder %s17_s10, %s1174_s13  ;;  %p1180_p2 = scmp.lt.s32.totalorder %s1174_s13, %s1174_s13 }
   0x7   :  { %p1181_p3 = por %p1180_p2, %p1179_p1 }
   0x9   :  { %p1182_p4 = pnand %p1181_p3, %p1175_p0 }
   0xb   :  { %1185 = shalt.err (!%p1182_p4)
}
   0xc   :  { %19 = dma.hbm_to_vmem [thread:$0]  %s1863_s0, 256, %s17_s10, [#allocation3]  }
   0xd   :  { %s1194_s16 = scalar_lea.vmem %s26_s12, 4096  ;;  %p1199_p6 = scmp.lt.s32.totalorder %s26_s12, %s26_s12 }
   0xe   :  { %p1195_p5 = scmp.ne.s32.totalorder %s26_s12, %s1194_s16  ;;  %p1200_p7 = scmp.lt.s32.totalorder %s1194_s16, %s1194_s16 }
  0x10   :  { %p1201_p8 = por %p1200_p7, %p1199_p6 }
  0x12   :  { %p1202_p9 = pnand %p1201_p8, %p1195_p5 }
  0x14   :  { %1205 = shalt.err (!%p1202_p9)
}
  0x15   :  { %s1234_s17 = smov 128   ;;  %s1235_s18 = smov 8  }
  0x16   :  { %31 = dma.hbm_to_vmem [thread:$0]  %s1864_s1, 4096, %s26_s12, [#allocation6], %s1234_s17, %s1234_s17, %s1235_s18  }
  0x17   :  { %1226 = dma.done.wait [#allocation3], 256  }
  0x18   :  { %1227 = vsyncadd [#allocation3], 4294967040 }
  0x19   :  { %1228 = dma.done.wait [#allocation6], 4096  }
  0x1a   :  { %1229 = vsyncadd [#allocation6], 4294963200  ;;  %v71_v0 = vld [vmem:[#allocation5 + $0xf8] sm:$0xff]  ;;  %v70_v2 = vld [vmem:[#allocation5 + $0xf0] sm:$0xff]  ;;  %s1236_s0 = smov [#allocation7]  }
  0x1b   :  { %v55_v1 = vld [vmem:[#allocation5 + $0x78] sm:$0xff]  ;;  %v1258_v3 = vand.u32 4294901760, %v71_v0  ;;  %v1262_v5 = vand.u32 4294901760, %v70_v2  ;;  %v54_v6 = vld [vmem:[#allocation5 + $0x70] sm:$0xff]  ;;  %v69_v7 = vld [vmem:[#allocation5 + $0xe8] sm:$0xff]  ;;  %s941_s1 = sshll.u32 %s1236_s0, 4  ;;  %s942_s1 = int_to_ptr.vmem [resolvable:$true] %s941_s1 }
  0x1c   :  { %v1260_v4 = vand.u32 4294901760, %v55_v1  ;;  %v53_v8 = vld [vmem:[#allocation5 + $0x68] sm:$0xff]  ;;  %v1264_v9 = vand.u32 4294901760, %v54_v6  ;;  %v1266_v10 = vand.u32 4294901760, %v69_v7  ;;  %v68_v12 = vld [vmem:[#allocation5 + $0xe0] sm:$0xff]  ;;  %v67_v14 = vld [vmem:[#allocation5 + $0xd8] sm:$0xff]  ;;  %p1211_p11 = scmp.lt.s32.totalorder %s942_s1, %s942_s1 }
  0x1d   :  { %v1268_v11 = vand.u32 4294901760, %v53_v8  ;;  %v52_v13 = vld [vmem:[#allocation5 + $0x60] sm:$0xff]  ;;  %951 = vmatprep.subr.mxu0 %v1258_v3  ;;  %v1271_v15 = vand.u32 4294901760, %v68_v12  ;;  %v1275_v17 = vand.u32 4294901760, %v67_v14  ;;  %v1278_v18 = vsub.f32 %v71_v0, %v1258_v3  ;;  %v1280_v19 = vld [vmem:[#allocation5 + $0x58] sm:$0xff]  ;;  %v1282_v20 = vld [vmem:[#allocation5 + $0xd0] sm:$0xff] }
  0x1e   :  { %v1273_v16 = vand.u32 4294901760, %v52_v13  ;;  %v1284_v21 = vld [vmem:[#allocation5 + $0x50] sm:$0xff]  ;;  %952 = vmatpush3.msra.mxu0 %v1260_v4  ;;  %v1288_v22 = vand.u32 4294901760, %v1280_v19  ;;  %v1291_v23 = vsub.f32 %v55_v1, %v1260_v4  ;;  %v1294_v24 = vand.u32 4294901760, %v1282_v20  ;;  %v1299_v26 = vld [vmem:[#allocation5 + $0xc8] sm:$0xff]  ;;  %v1303_v28 = vld [vmem:[#allocation5 + $0xc0] sm:$0xff] }
  0x1f   :  { %v1297_v25 = vsub.f32 %v70_v2, %v1262_v5  ;;  %v1301_v27 = vld [vmem:[#allocation5 + $0x48] sm:$0xff]  ;;  %953 = vmatprep.subr.mxu0 %v1262_v5  ;;  %v1879_v29 = vand.u32 4294901760, %v1278_v18  ;;  %v1308_v30 = vand.u32 4294901760, %v1284_v21  ;;  %v1311_v31 = vsub.f32 %v54_v6, %v1264_v9  ;;  %v1325_v37 = vld [vmem:[#allocation5 + $0x40] sm:$0xff]  ;;  %v1349_v46 = vld [vmem:[#allocation5 + $0xb8] sm:$0xff]  ;;  %s1206_s21 = scalar_lea.vmem %s942_s1, 128 }
  0x20   :  { %1934 = vst [vmem:[#allocation11_spill] sm:$0xff] %v1294_v24  ;;  %v1314_v32 = vand.u32 4294901760, %v1299_v26  ;;  %954 = vmatpush3.msra.mxu0 %v1264_v9  ;;  %v1877_v33 = vand.u32 4294901760, %v1291_v23  ;;  %v1320_v35 = vsub.f32 %v69_v7, %v1266_v10  ;;  %v1323_v36 = vand.u32 4294901760, %v1301_v27  ;;  %v1359_v51 = vld [vmem:[#allocation5 + $0x38] sm:$0xff]  ;;  %v1366_v56 = vld [vmem:[#allocation5 + $0xb0] sm:$0xff]  ;;  %p1207_p10 = scmp.ne.s32.totalorder %s942_s1, %s1206_s21  ;;  %p1212_p12 = scmp.lt.s32.totalorder %s1206_s21, %s1206_s21 }
  0x21   :  { %1935 = vst [vmem:[#allocation12_spill] sm:$0xff] %v1308_v30  ;;  %v1876_v34 = vand.u32 4294901760, %v1297_v25  ;;  %955 = vmatprep.subr.mxu0 %v1266_v10  ;;  %v300_v38 = vsub.f32 %v1278_v18, %v1879_v29  ;;  %v1874_v39 = vand.u32 4294901760, %v1311_v31  ;;  %v1333_v40 = vsub.f32 %v53_v8, %v1268_v11  ;;  %v1378_v61 = vld [vmem:[#allocation5 + $0x30] sm:$0xff]  ;;  %v1390_v2 = vld [vmem:[#allocation5 + $0xa8] sm:$0xff] }
  0x22   :  { %1936 = vst [vmem:[#allocation13_spill] sm:$0xff] %v1314_v32  ;;  %1937 = vst [vmem:[#allocation14_spill] sm:$0xff] %v1323_v36  ;;  %v1336_v41 = vand.u32 4294901760, %v1303_v28  ;;  %956 = vmatpush3.msra.mxu0 %v1268_v11  ;;  %v188_v42 = vsub.f32 %v1291_v23, %v1877_v33  ;;  %v1872_v44 = vand.u32 4294901760, %v1320_v35  ;;  %v1347_v45 = vsub.f32 %v68_v12, %v1271_v15  ;;  %p1213_p13 = por %p1212_p12, %p1211_p11 }
  0x23   :  { %v307_v43 = vsub.f32 %v1297_v25, %v1876_v34  ;;  %957 = vmatprep.subr.mxu0 %v1271_v15  ;;  %v301_v47 = vand.u32 4294901760, %v300_v38  ;;  %v195_v48 = vsub.f32 %v1311_v31, %v1874_v39  ;;  %v1871_v49 = vand.u32 4294901760, %v1333_v40  ;;  %v1481_v39 = vld [vmem:[#allocation5 + $0x90] sm:$0xff] }
  0x24   :  { %1938 = vst [vmem:[#allocation15_spill] sm:$0xff] %v1336_v41  ;;  %v1357_v50 = vand.u32 4294901760, %v1325_v37  ;;  %958 = vmatpush3.msra.mxu0 %v1273_v16  ;;  %v189_v52 = vand.u32 4294901760, %v188_v42  ;;  %v314_v54 = vsub.f32 %v1320_v35, %v1872_v44  ;;  %v1869_v55 = vand.u32 4294901760, %v1347_v45  ;;  %v1491_v34 = vld [vmem:[#allocation5 + $0x10] sm:$0xff]  ;;  %p1214_p0 = pnand %p1213_p13, %p1207_p10 }
  0x25   :  { %v308_v53 = vand.u32 4294901760, %v307_v43  ;;  %959 = vmatprep.subr.mxu0 %v1275_v17  ;;  %986 = vmatprep.subr.mxu1 %v301_v47  ;;  %v196_v57 = vand.u32 4294901760, %v195_v48  ;;  %v202_v58 = vsub.f32 %v1333_v40, %v1871_v49  ;;  %v1373_v59 = vsub.f32 %v52_v13, %v1273_v16  ;;  %v1401_v13 = vld [vmem:[#allocation5 + $0x28] sm:$0xff]  ;;  %v1468_v49 = vld [vmem:[#allocation5 + $0x18] sm:$0xff] }
  0x26   :  { %1939 = vst [vmem:[#allocation16_spill] sm:$0xff] %v1357_v50  ;;  %v1376_v60 = vand.u32 4294901760, %v1349_v46  ;;  %960 = vmatpush3.msra.mxu0 %v1288_v22  ;;  %987 = vmatpush3.msra.mxu1 %v189_v52  ;;  %v315_v62 = vand.u32 4294901760, %v314_v54  ;;  %v321_v63 = vsub.f32 %v1347_v45, %v1869_v55  ;;  %v1385_v0 = vsub.f32 %v67_v14, %v1275_v17 }
  0x27   :  { %v1388_v1 = vand.u32 4294901760, %v1359_v51  ;;  %961 = vmatprep.subr.mxu0 %v1294_v24  ;;  %988 = vmatprep.subr.mxu1 %v308_v53  ;;  %v203_v6 = vand.u32 4294901760, %v202_v58  ;;  %v1867_v7 = vand.u32 4294901760, %v1373_v59  ;;  %v1396_v8 = vsub.f32 %v1280_v19, %v1288_v22 }
  0x28   :  { %1940 = vst [vmem:[#allocation17_spill] sm:$0xff] %v1376_v60  ;;  %v1399_v12 = vand.u32 4294901760, %v1366_v56  ;;  %962 = vmatpush3.msra.mxu0 %v1308_v30  ;;  %989 = vmatpush3.msra.mxu1 %v196_v57  ;;  %v322_v14 = vand.u32 4294901760, %v321_v63  ;;  %v1866_v38 = vand.u32 4294901760, %v1385_v0  ;;  %v1407_v42 = vsub.f32 %v1282_v20, %v1294_v24  ;;  %v1424_v20 = vld [vmem:[#allocation5 + $0xa0] sm:$0xff] }
  0x29   :  { %1941 = vst [vmem:[#allocation18_spill] sm:$0xff] %v1388_v1  ;;  %v1410_v43 = vand.u32 4294901760, %v1378_v61  ;;  %963 = vmatprep.subr.mxu0 %v1314_v32  ;;  %990 = vmatprep.subr.mxu1 %v315_v62  ;;  %v209_v19 = vsub.f32 %v1373_v59, %v1867_v7  ;;  %v1868_v47 = vand.u32 4294901760, %v1396_v8  ;;  %v1419_v48 = vsub.f32 %v1284_v21, %v1308_v30 }
  0x2a   :  { %1942 = vst [vmem:[#allocation19_spill] sm:$0xff] %v1399_v12  ;;  %v1422_v52 = vand.u32 4294901760, %v1390_v2  ;;  %964 = vmatpush3.msra.mxu0 %v1323_v36  ;;  %991 = vmatpush3.msra.mxu1 %v203_v6  ;;  %v328_v53 = vsub.f32 %v1385_v0, %v1866_v38  ;;  %v1870_v54 = vand.u32 4294901760, %v1407_v42  ;;  %v1433_v57 = vsub.f32 %v1299_v26, %v1314_v32  ;;  %v1447_v38 = vld [vmem:[#allocation5 + $0x20] sm:$0xff] }
  0x2b   :  { %1943 = vst [vmem:[#allocation20_spill] sm:$0xff] %v1410_v43  ;;  %v1436_v21 = vand.u32 4294901760, %v1401_v13  ;;  %965 = vmatprep.subr.mxu0 %v1336_v41  ;;  %992 = vmatprep.subr.mxu1 %v322_v14  ;;  %v210_v58 = vand.u32 4294901760, %v209_v19  ;;  %v216_v62 = vsub.f32 %v1396_v8, %v1868_v47  ;;  %v1873_v63 = vand.u32 4294901760, %v1419_v48  ;;  %v1457_v47 = vld [vmem:[#allocation5 + $0x98] sm:$0xff] }
  0x2c   :  { %1944 = vst [vmem:[#allocation21_spill] sm:$0xff] %v1422_v52  ;;  %v1445_v6 = vsub.f32 %v1301_v27, %v1323_v36  ;;  %966 = vmatpush3.msra.mxu0 %v1357_v50  ;;  %v329_v26 = vand.u32 4294901760, %v328_v53  ;;  %v335_v14 = vsub.f32 %v1407_v42, %v1870_v54  ;;  %v1875_v19 = vand.u32 4294901760, %v1433_v57  ;;  %v39_v36 = vld [vmem:[#allocation2 + $0x8] sm:$0xff] }
  0x2d   :  { %1945 = vst [vmem:[#allocation22_spill] sm:$0xff] %v1436_v21  ;;  %v1455_v7 = vand.u32 4294901760, %v1424_v20  ;;  %993 = vmatpush3.msra.mxu1 %v210_v58  ;;  %967 = vmatprep.subr.mxu0 %v1376_v60  ;;  %v217_v27 = vand.u32 4294901760, %v216_v62  ;;  %v223_v55 = vsub.f32 %v1419_v48, %v1873_v63  ;;  %v1466_v54 = vsub.f32 %v1303_v28, %v1336_v41 }
  0x2e   :  { %v1878_v53 = vand.u32 4294901760, %v1445_v6  ;;  %994 = vmatprep.subr.mxu1 %v329_v26  ;;  %968 = vmatpush3.msra.mxu0 %v1388_v1  ;;  %v336_v44 = vand.u32 4294901760, %v335_v14  ;;  %v342_v58 = vsub.f32 %v1433_v57, %v1875_v19  ;;  %v1475_v62 = vand.u32 4294901760, %v1447_v38 }
  0x2f   :  { %1946 = vst [vmem:[#allocation23_spill] sm:$0xff] %v1455_v7  ;;  %v1479_v63 = vsub.f32 %v1325_v37, %v1357_v50  ;;  %995 = vmatpush3.msra.mxu1 %v217_v27  ;;  %969 = vmatprep.subr.mxu0 %v1399_v12  ;;  %v224_v28 = vand.u32 4294901760, %v223_v55  ;;  %v1882_v14 = vand.u32 4294901760, %v1466_v54  ;;  %v1489_v19 = vand.u32 4294901760, %v1457_v47 }
  0x30   :  { %1947 = vst [vmem:[#allocation24_spill] sm:$0xff] %v1475_v62  ;;  %v230_v26 = vsub.f32 %v1445_v6, %v1878_v53  ;;  %996 = vmatprep.subr.mxu1 %v336_v44  ;;  %970 = vmatpush3.msra.mxu0 %v1410_v43  ;;  %v343_v37 = vand.u32 4294901760, %v342_v58  ;;  %v1497_v55 = vsub.f32 %v1349_v46, %v1376_v60  ;;  %v1500_v33 = vand.u32 4294901760, %v1468_v49  ;;  %v1502_v53 = vld [vmem:[#allocation5 + $0x88] sm:$0xff] }
  0x31   :  { %v1885_v27 = vand.u32 4294901760, %v1479_v63  ;;  %997 = vmatpush3.msra.mxu1 %v224_v28  ;;  %971 = vmatprep.subr.mxu0 %v1422_v52  ;;  %v349_v44 = vsub.f32 %v1466_v54, %v1882_v14  ;;  %v1510_v58 = vsub.f32 %v1359_v51, %v1388_v1  ;;  %v1513_v46 = vand.u32 4294901760, %v1481_v39  ;;  %v1527_v51 = vld [vmem:[#allocation5 + $0x8] sm:$0xff] }
  0x32   :  { %1948 = vst [vmem:[#allocation25_spill] sm:$0xff] %v1500_v33  ;;  %v231_v29 = vand.u32 4294901760, %v230_v26  ;;  %998 = vmatprep.subr.mxu1 %v343_v37  ;;  %972 = vmatpush3.msra.mxu0 %v1436_v21  ;;  %v1522_v60 = vsub.f32 %v1366_v56, %v1399_v12  ;;  %v1525_v14 = vand.u32 4294901760, %v1491_v34  ;;  %v1536_v26 = vand.u32 4294901760, %v1502_v53  ;;  %v1538_v56 = vld [vmem:[#allocation5 + $0x80] sm:$0xff] }
  0x33   :  { %1949 = vst [vmem:[#allocation26_spill] sm:$0xff] %v1513_v46  ;;  %v237_v28 = vsub.f32 %v1479_v63, %v1885_v27  ;;  %973 = vmatprep.subr.mxu0 %v1455_v7  ;;  %v350_v37 = vand.u32 4294901760, %v349_v44  ;;  %v1533_v27 = vsub.f32 %v1378_v61, %v1410_v43  ;;  %v1952_v50 = vand.u32 4294901760, %v1497_v55  ;;  %v1561_v44 = vld [vmem:[#allocation5] sm:$0xff] }
  0x34   :  { %1950 = vst [vmem:[#allocation27_spill] sm:$0xff] %v1525_v14  ;;  %999 = vmatpush3.msra.mxu1 %v231_v29  ;;  %1951 = vst [vmem:[#allocation28_spill] sm:$0xff] %v1536_v26  ;;  %974 = vmatpush3.msra.mxu0 %v1475_v62  ;;  %v1547_v1 = vsub.f32 %v1390_v2, %v1422_v52  ;;  %v1954_v61 = vand.u32 4294901760, %v1510_v58  ;;  %v1569_v41 = vand.u32 4294901760, %v1538_v56  ;;  %v1585_v24 = vand.u32 4294901760, %v1561_v44 }
  0x35   :  { %v238_v12 = vand.u32 4294901760, %v237_v28  ;;  %v356_v29 = vsub.f32 %v1497_v55, %v1952_v50  ;;  %1000 = vmatprep.subr.mxu1 %v350_v37  ;;  %975 = vmatprep.subr.mxu0 %v1489_v19  ;;  %v1555_v28 = vand.u32 4294901760, %v1527_v51  ;;  %v1559_v50 = vsub.f32 %v1401_v13, %v1436_v21 }
  0x36   :  { %1953 = vst [vmem:[#allocation29_spill] sm:$0xff] %v1547_v1  ;;  %v244_v43 = vsub.f32 %v1510_v58, %v1954_v61  ;;  %976 = vmatpush3.msra.mxu0 %v1500_v33  ;;  %v1955_v37 = vand.u32 4294901760, %v1522_v60  ;;  %v1956_v13 = vand.u32 4294901760, %v1533_v27  ;;  %v1578_v21 = vsub.f32 %v1424_v20, %v1455_v7 }
  0x37   :  { %1001 = vmatpush3.msra.mxu1 %v238_v12  ;;  %v357_v2 = vand.u32 4294901760, %v356_v29  ;;  %977 = vmatprep.subr.mxu0 %v1513_v46  ;;  %v1957_v30 = vand.u32 4294901760, %v1547_v1  ;;  %v1958_v20 = vand.u32 4294901760, %v1559_v50  ;;  %v1596_v7 = vand.u32 4294901760, %v39_v36 }
  0x38   :  { %v363_v52 = vsub.f32 %v1522_v60, %v1955_v37  ;;  %v245_v32 = vand.u32 4294901760, %v244_v43  ;;  %v251_v12 = vsub.f32 %v1533_v27, %v1956_v13  ;;  %v38_v37 = vld [vmem:[#allocation2] sm:$0xff]  ;;  %978 = vmatpush3.msra.mxu0 %v1525_v14  ;;  %v1589_v13 = vsub.f32 %v1447_v38, %v1475_v62 }
  0x39   :  { %1002 = vmatprep.subr.mxu1 %v357_v2  ;;  %v370_v43 = vsub.f32 %v1547_v1, %v1957_v30  ;;  %979 = vmatprep.subr.mxu0 %v1536_v26  ;;  %v1910_v2 = vand.u32 4294901760, %v1578_v21  ;;  %1959 = vst [vmem:[#allocation30_spill] sm:$0xff] %v1596_v7  ;;  %v1604_v38 = vand.u32 4294901760, %v38_v37 }
  0x3a   :  { %v364_v61 = vand.u32 4294901760, %v363_v52  ;;  %1003 = vmatpush3.msra.mxu1 %v245_v32  ;;  %v252_v29 = vand.u32 4294901760, %v251_v12  ;;  %v258_v52 = vsub.f32 %v1559_v50, %v1958_v20  ;;  %980 = vmatpush3.msra.mxu0 %v1555_v28  ;;  %v1911_v1 = vand.u32 4294901760, %v1589_v13 }
  0x3b   :  { %v371_v30 = vand.u32 4294901760, %v370_v43  ;;  %v1602_v32 = vsub.f32 %v1457_v47, %v1489_v19  ;;  %1960 = vst [vmem:[#allocation31_spill] sm:$0xff] %v1604_v38  ;;  %981 = vmatprep.subr.mxu0 %v1569_v41  ;;  %v377_v20 = vsub.f32 %v1578_v21, %v1910_v2  ;;  %v1615_v43 = vsub.f32 %v1468_v49, %v1500_v33 }
  0x3c   :  { %1004 = vmatprep.subr.mxu1 %v364_v61  ;;  %v259_v12 = vand.u32 4294901760, %v258_v52  ;;  %v1611_v61 = vsub.f32 %v39_v36, %v1596_v7  ;;  %982 = vmatpush3.msra.mxu0 %v1585_v24  ;;  %v265_v47 = vsub.f32 %v1589_v13, %v1911_v1  ;;  %v1623_v52 = vsub.f32 %v38_v37, %v1604_v38 }
  0x3d   :  { %1005 = vmatpush3.msra.mxu1 %v252_v29  ;;  %v1627_v36 = vsub.f32 %v1481_v39, %v1513_v46  ;;  %v378_v2 = vand.u32 4294901760, %v377_v20  ;;  %1021 = vmatprep.subr.mxu0 %v1278_v18  ;;  %v1634_v1 = vsub.f32 %v1491_v34, %v1525_v14  ;;  %v1961_v37 = vand.u32 4294901760, %v1602_v32 }
  0x3e   :  { %1006 = vmatprep.subr.mxu1 %v371_v30  ;;  %v1916_v49 = vand.u32 4294901760, %v1611_v61  ;;  %v1919_v30 = vand.u32 4294901760, %v1615_v43  ;;  %v266_v29 = vand.u32 4294901760, %v265_v47  ;;  %409 = vmatprep.mubr.f32.mxu1 %v1596_v7  ;;  %v1661_v14 = vsub.f32 %v1527_v51, %v1555_v28 }
  0x3f   :  { %1007 = vmatpush3.msra.mxu1 %v259_v12  ;;  %v384_v33 = vsub.f32 %v1602_v32, %v1961_v37  ;;  %v1651_v37 = vsub.f32 %v1502_v53, %v1536_v26  ;;  %v1962_v12 = vand.u32 4294901760, %v1623_v52  ;;  %v1963_v7 = vand.u32 4294901760, %v1627_v36 }
  0x40   :  { %1008 = vmatprep.subr.mxu1 %v378_v2  ;;  %v171_v20 = vsub.f32 %v1611_v61, %v1916_v49  ;;  %v272_v34 = vsub.f32 %v1615_v43, %v1919_v30  ;;  %1964 = vst [vmem:[#allocation32_spill] sm:$0xff] %v1661_v14  ;;  %v1965_v46 = vand.u32 4294901760, %v1634_v1 }
  0x41   :  { %1009 = vmatpush3.msra.mxu1 %v266_v29  ;;  %v385_v39 = vand.u32 4294901760, %v384_v33  ;;  %v177_v2 = vsub.f32 %v1623_v52, %v1962_v12  ;;  %v391_v49 = vsub.f32 %v1627_v36, %v1963_v7  ;;  %v1927_v33 = vand.u32 4294901760, %v1651_v37 }
  0x42   :  { %v172_v30 = vand.u32 4294901760, %v171_v20  ;;  %v273_v47 = vand.u32 4294901760, %v272_v34  ;;  %v279_v53 = vsub.f32 %v1634_v1, %v1965_v46  ;;  %v1926_v12 = vand.u32 4294901760, %v1661_v14 }
  0x43   :  { %1010 = vmatprep.subr.mxu1 %v385_v39  ;;  %v178_v29 = vand.u32 4294901760, %v177_v2  ;;  %v392_v26 = vand.u32 4294901760, %v391_v49  ;;  %v1670_v7 = vsub.f32 %v1538_v56, %v1569_v41  ;;  %v398_v20 = vsub.f32 %v1651_v37, %v1927_v33 }
  0x44   :  { %173 = vmatprep.mubr.f32.mxu0 %v172_v30  ;;  %1011 = vmatpush3.msra.mxu1 %v273_v47  ;;  %v280_v51 = vand.u32 4294901760, %v279_v53  ;;  %v1677_v46 = vsub.f32 %v1561_v44, %v1585_v24  ;;  %v286_v49 = vsub.f32 %v1661_v14, %v1926_v12  ;;  %v1968_v53 = vld [vmem:[#allocation11_spill] sm:$0xff]  ;;  %v1982_v33 = vand.u32 4294901760, %v1278_v18 }
  0x45   :  { %1966 = vst [vmem:[#allocation33_spill] sm:$0xff] %v1670_v7  ;;  %179 = vmatmul.mubr.f32.vlgmr.msra.gmra.mxu0 %v178_v29  ;;  %1012 = vmatprep.subr.mxu1 %v392_v26  ;;  %v1925_v56 = vand.u32 4294901760, %v1670_v7  ;;  %v399_v30 = vand.u32 4294901760, %v398_v20  ;;  %v1969_v29 = vld [vmem:[#allocation12_spill] sm:$0xff]  ;;  %v1971_v20 = vld [vmem:[#allocation13_spill] sm:$0xff]  ;;  %v1981_v12 = vld [vmem:[#allocation23_spill] sm:$0xff] }
  0x46   :  { %1967 = vst [vmem:[#allocation34_spill] sm:$0xff] %v1677_v46  ;;  %1022 = vmatpush3.msra.mxu0 %v1291_v23  ;;  %1013 = vmatpush3.msra.mxu1 %v280_v51  ;;  %v1924_v39 = vand.u32 4294901760, %v1677_v46  ;;  %v287_v34 = vand.u32 4294901760, %v286_v49  ;;  %v1970_v51 = vld [vmem:[#allocation29_spill] sm:$0xff]  ;;  %v1972_v49 = vld [vmem:[#allocation14_spill] sm:$0xff]  ;;  %v1990_v18 = vand.u32 4294901760, %v1320_v35 }
  0x47   :  { %1023 = vmatprep.subr.mxu0 %v1297_v25  ;;  %v405_v44 = vsub.f32 %v1670_v7, %v1925_v56  ;;  %546 = vmatprep.mubr.f32.mxu0 %v1611_v61  ;;  %v1980_v56 = vld [vmem:[#allocation22_spill] sm:$0xff] }
  0x48   :  { %1024 = vmatpush3.msra.mxu0 %v1311_v31  ;;  %1014 = vmatprep.subr.mxu1 %v399_v30  ;;  %v293_v26 = vsub.f32 %v1677_v46, %v1924_v39  ;;  %v1973_v30 = vld [vmem:[#allocation15_spill] sm:$0xff]  ;;  %v1979_v39 = vld [vmem:[#allocation21_spill] sm:$0xff] }
  0x49   :  { %1025 = vmatprep.subr.mxu0 %v1320_v35  ;;  %1015 = vmatpush3.msra.mxu1 %v287_v34  ;;  %v406_v47 = vand.u32 4294901760, %v405_v44  ;;  %v1974_v34 = vld [vmem:[#allocation16_spill] sm:$0xff]  ;;  %v1975_v44 = vld [vmem:[#allocation17_spill] sm:$0xff]  ;;  %v1995_v35 = vand.u32 4294901760, %v1623_v52 }
  0x4a   :  { %1026 = vmatpush3.msra.mxu0 %v1333_v40  ;;  %v294_v2 = vand.u32 4294901760, %v293_v26  ;;  %v1976_v26 = vld [vmem:[#allocation18_spill] sm:$0xff] }
  0x4b   :  { %1016 = vmatprep.subr.mxu1 %v406_v47  ;;  %1027 = vmatprep.subr.mxu0 %v1347_v45  ;;  %v1977_v47 = vld [vmem:[#allocation19_spill] sm:$0xff] }
  0x4c   :  { %1017 = vmatpush3.msra.mxu1 %v294_v2  ;;  %1028 = vmatpush3.msra.mxu0 %v1373_v59  ;;  %v1978_v2 = vld [vmem:[#allocation20_spill] sm:$0xff] }
  0x4d   :  { %411 = vmatmul.mubr.f32.vlgmr.msra.gmra.mxu1 %v1604_v38  ;;  %1029 = vmatprep.subr.mxu0 %v1385_v0  ;;  %v1983_v38 = vld [vmem:[#allocation25_spill] sm:$0xff] }
  0x4e   :  { %1056 = vmatprep.subr.mxu1 %v1258_v3  ;;  %1030 = vmatpush3.msra.mxu0 %v1396_v8 }
  0x4f   :  { %1057 = vmatpush3.msra.mxu1 %v1260_v4  ;;  %1031 = vmatprep.subr.mxu0 %v1407_v42 }
  0x50   :  { %1058 = vmatprep.subr.mxu1 %v1262_v5  ;;  %1032 = vmatpush3.msra.mxu0 %v1419_v48 }
  0x51   :  { %1059 = vmatpush3.msra.mxu1 %v1264_v9  ;;  %1033 = vmatprep.subr.mxu0 %v1433_v57 }
  0x52   :  { %1060 = vmatprep.subr.mxu1 %v1266_v10  ;;  %1034 = vmatpush3.msra.mxu0 %v1445_v6 }
  0x53   :  { %1061 = vmatpush3.msra.mxu1 %v1268_v11  ;;  %1035 = vmatprep.subr.mxu0 %v1466_v54 }
  0x54   :  { %1062 = vmatprep.subr.mxu1 %v1271_v15  ;;  %1036 = vmatpush3.msra.mxu0 %v1479_v63 }
  0x55   :  { %1063 = vmatpush3.msra.mxu1 %v1273_v16  ;;  %1037 = vmatprep.subr.mxu0 %v1497_v55 }
  0x56   :  { %1064 = vmatprep.subr.mxu1 %v1275_v17  ;;  %1038 = vmatpush3.msra.mxu0 %v1510_v58 }
  0x57   :  { %1065 = vmatpush3.msra.mxu1 %v1288_v22  ;;  %1039 = vmatprep.subr.mxu0 %v1522_v60 }
  0x58   :  { %1066 = vmatprep.subr.mxu1 %v1968_v53  ;;  %1040 = vmatpush3.msra.mxu0 %v1533_v27 }
  0x59   :  { %1067 = vmatpush3.msra.mxu1 %v1969_v29  ;;  %1041 = vmatprep.subr.mxu0 %v1970_v51 }
  0x5a   :  { %1068 = vmatprep.subr.mxu1 %v1971_v20  ;;  %1042 = vmatpush3.msra.mxu0 %v1559_v50 }
  0x5b   :  { %1069 = vmatpush3.msra.mxu1 %v1972_v49  ;;  %1043 = vmatprep.subr.mxu0 %v1578_v21 }
  0x5c   :  { %1070 = vmatprep.subr.mxu1 %v1973_v30  ;;  %1044 = vmatpush3.msra.mxu0 %v1589_v13 }
  0x5d   :  { %1071 = vmatpush3.msra.mxu1 %v1974_v34  ;;  %1045 = vmatprep.subr.mxu0 %v1602_v32 }
  0x5e   :  { %1072 = vmatprep.subr.mxu1 %v1975_v44  ;;  %1046 = vmatpush3.msra.mxu0 %v1615_v43 }
  0x5f   :  { %1073 = vmatpush3.msra.mxu1 %v1976_v26  ;;  %1047 = vmatprep.subr.mxu0 %v1627_v36 }
  0x60   :  { %1074 = vmatprep.subr.mxu1 %v1977_v47  ;;  %1048 = vmatpush3.msra.mxu0 %v1634_v1 }
  0x61   :  { %1075 = vmatpush3.msra.mxu1 %v1978_v2  ;;  %1049 = vmatprep.subr.mxu0 %v1651_v37 }
  0x62   :  { %1076 = vmatprep.subr.mxu1 %v1979_v39  ;;  %1050 = vmatpush3.msra.mxu0 %v1661_v14  ;;  %v1984_v14 = vand.u32 4294901760, %v1291_v23  ;;  %v1991_v23 = vand.u32 4294901760, %v1333_v40  ;;  %v1997_v40 = vand.u32 4294901760, %v1396_v8  ;;  %v2012_v8 = vand.u32 4294901760, %v1602_v32  ;;  %v2026_v32 = vld [vmem:[#allocation24_spill] sm:$0xff] }
  0x63   :  { %1077 = vmatpush3.msra.mxu1 %v1980_v56  ;;  %1051 = vmatprep.subr.mxu0 %v1670_v7  ;;  %v1985_v56 = vld [vmem:[#allocation26_spill] sm:$0xff]  ;;  %v1989_v7 = vld [vmem:[#allocation28_spill] sm:$0xff] }
  0x64   :  { %1078 = vmatprep.subr.mxu1 %v1981_v12  ;;  %1052 = vmatpush3.msra.mxu0 %v1677_v46  ;;  %v1986_v12 = vand.u32 4294901760, %v1297_v25  ;;  %v1987_v46 = vld [vmem:[#allocation27_spill] sm:$0xff]  ;;  %v1992_v25 = vand.u32 4294901760, %v1347_v45  ;;  %v1998_v45 = vand.u32 4294901760, %v1407_v42  ;;  %v2013_v42 = vand.u32 4294901760, %v1615_v43 }
  0x65   :  { %1079 = vmatpush3.msra.mxu1 %v1475_v62  ;;  %549 = vmatmul.mubr.f32.vlgmr.msra.gmra.mxu0 %v1623_v52  ;;  %v1988_v62 = vand.u32 4294901760, %v1311_v31  ;;  %v1993_v31 = vand.u32 4294901760, %v1611_v61  ;;  %v2027_v61 = vld [vmem:[#allocation31_spill] sm:$0xff] }
  0x66   :  { %1080 = vmatprep.subr.mxu1 %v1489_v19  ;;  %1091 = vmatprep.subr.mxu0 %v1982_v33 }
  0x67   :  { %1081 = vmatpush3.msra.mxu1 %v1983_v38  ;;  %1092 = vmatpush3.msra.mxu0 %v1984_v14  ;;  %v1996_v14 = vand.u32 4294901760, %v1385_v0  ;;  %v2000_v0 = vand.u32 4294901760, %v1433_v57  ;;  %v2016_v57 = vand.u32 4294901760, %v1651_v37 }
  0x68   :  { %1082 = vmatprep.subr.mxu1 %v1985_v56  ;;  %1093 = vmatprep.subr.mxu0 %v1986_v12 }
  0x69   :  { %1083 = vmatpush3.msra.mxu1 %v1987_v46  ;;  %1094 = vmatpush3.msra.mxu0 %v1988_v62  ;;  %v1994_v62 = vand.u32 4294901760, %v1373_v59  ;;  %v1999_v59 = vand.u32 4294901760, %v1419_v48  ;;  %v2014_v48 = vand.u32 4294901760, %v1627_v36 }
  0x6a   :  { %1084 = vmatprep.subr.mxu1 %v1989_v7  ;;  %1095 = vmatprep.subr.mxu0 %v1990_v18 }
  0x6b   :  { %1085 = vmatpush3.msra.mxu1 %v1555_v28  ;;  %1096 = vmatpush3.msra.mxu0 %v1991_v23 }
  0x6c   :  { %1086 = vmatprep.subr.mxu1 %v1569_v41  ;;  %1097 = vmatprep.subr.mxu0 %v1992_v25 }
  0x6d   :  { %1087 = vmatpush3.msra.mxu1 %v1585_v24  ;;  %653 = vmatprep.mubr.f32.mxu1 %v1993_v31 }
  0x6e   :  { %1098 = vmatpush3.msra.mxu0 %v1994_v62  ;;  %657 = vmatmul.mubr.f32.vlgmr.msra.gmra.mxu1 %v1995_v35 }
  0x6f   :  { %1099 = vmatprep.subr.mxu0 %v1996_v14  ;;  %1126 = vmatprep.subr.mxu1 %v1258_v3  ;;  %v2001_v3 = vand.u32 4294901760, %v1445_v6  ;;  %v2019_v6 = vld [vmem:[#allocation22_spill] sm:$0xff] }
  0x70   :  { %1100 = vmatpush3.msra.mxu0 %v1997_v40  ;;  %1127 = vmatpush3.msra.mxu1 %v1260_v4  ;;  %v2002_v4 = vand.u32 4294901760, %v1466_v54  ;;  %v2015_v54 = vand.u32 4294901760, %v1634_v1 }
  0x71   :  { %1101 = vmatprep.subr.mxu0 %v1998_v45  ;;  %1128 = vmatprep.subr.mxu1 %v1262_v5  ;;  %v2003_v5 = vand.u32 4294901760, %v1479_v63 }
  0x72   :  { %1102 = vmatpush3.msra.mxu0 %v1999_v59  ;;  %1129 = vmatpush3.msra.mxu1 %v1264_v9  ;;  %v2004_v9 = vand.u32 4294901760, %v1497_v55 }
  0x73   :  { %1103 = vmatprep.subr.mxu0 %v2000_v0  ;;  %1130 = vmatprep.subr.mxu1 %v1266_v10  ;;  %v2005_v10 = vand.u32 4294901760, %v1510_v58  ;;  %v2022_v58 = vld [vmem:[#allocation23_spill] sm:$0xff] }
  0x74   :  { %1104 = vmatpush3.msra.mxu0 %v2001_v3  ;;  %1131 = vmatpush3.msra.mxu1 %v1268_v11  ;;  %v2006_v11 = vand.u32 4294901760, %v1522_v60  ;;  %v2011_v60 = vand.u32 4294901760, %v1589_v13  ;;  %v2025_v13 = vld [vmem:[#allocation30_spill] sm:$0xff] }
  0x75   :  { %1105 = vmatprep.subr.mxu0 %v2002_v4  ;;  %1132 = vmatprep.subr.mxu1 %v1271_v15  ;;  %v2007_v15 = vand.u32 4294901760, %v1533_v27  ;;  %v2020_v27 = vld [vmem:[#allocation33_spill] sm:$0xff] }
  0x76   :  { %1106 = vmatpush3.msra.mxu0 %v2003_v5  ;;  %1133 = vmatpush3.msra.mxu1 %v1273_v16  ;;  %v2008_v16 = vand.u32 4294901760, %v1970_v51  ;;  %v2021_v55 = vand.u32 4294901760, %v2020_v27 }
  0x77   :  { %1107 = vmatprep.subr.mxu0 %v2004_v9  ;;  %1134 = vmatprep.subr.mxu1 %v1275_v17  ;;  %v2009_v17 = vand.u32 4294901760, %v1559_v50  ;;  %v2023_v50 = vld [vmem:[#allocation34_spill] sm:$0xff] }
  0x78   :  { %1108 = vmatpush3.msra.mxu0 %v2005_v10  ;;  %1135 = vmatpush3.msra.mxu1 %v1288_v22  ;;  %v2010_v22 = vand.u32 4294901760, %v1578_v21  ;;  %v2017_v21 = vld [vmem:[#allocation32_spill] sm:$0xff]  ;;  %v2024_v1 = vand.u32 4294901760, %v2023_v50 }
  0x79   :  { %1109 = vmatprep.subr.mxu0 %v2006_v11  ;;  %1136 = vmatprep.subr.mxu1 %v1968_v53  ;;  %v2018_v63 = vand.u32 4294901760, %v2017_v21 }
  0x7a   :  { %1110 = vmatpush3.msra.mxu0 %v2007_v15  ;;  %1137 = vmatpush3.msra.mxu1 %v1969_v29 }
  0x7b   :  { %1111 = vmatprep.subr.mxu0 %v2008_v16  ;;  %1138 = vmatprep.subr.mxu1 %v1971_v20 }
  0x7c   :  { %1112 = vmatpush3.msra.mxu0 %v2009_v17  ;;  %1139 = vmatpush3.msra.mxu1 %v1972_v49 }
  0x7d   :  { %1113 = vmatprep.subr.mxu0 %v2010_v22  ;;  %1140 = vmatprep.subr.mxu1 %v1973_v30 }
  0x7e   :  { %1114 = vmatpush3.msra.mxu0 %v2011_v60  ;;  %1141 = vmatpush3.msra.mxu1 %v1974_v34 }
  0x7f   :  { %1115 = vmatprep.subr.mxu0 %v2012_v8  ;;  %1142 = vmatprep.subr.mxu1 %v1975_v44 }
  0x80   :  { %1116 = vmatpush3.msra.mxu0 %v2013_v42  ;;  %1143 = vmatpush3.msra.mxu1 %v1976_v26 }
  0x81   :  { %1117 = vmatprep.subr.mxu0 %v2014_v48  ;;  %1144 = vmatprep.subr.mxu1 %v1977_v47 }
  0x82   :  { %1118 = vmatpush3.msra.mxu0 %v2015_v54  ;;  %1145 = vmatpush3.msra.mxu1 %v1978_v2 }
  0x83   :  { %1119 = vmatprep.subr.mxu0 %v2016_v57  ;;  %1146 = vmatprep.subr.mxu1 %v1979_v39 }
  0x84   :  { %1120 = vmatpush3.msra.mxu0 %v2018_v63  ;;  %1147 = vmatpush3.msra.mxu1 %v2019_v6 }
  0x85   :  { %1121 = vmatprep.subr.mxu0 %v2021_v55  ;;  %1148 = vmatprep.subr.mxu1 %v2022_v58 }
  0x86   :  { %1122 = vmatpush3.msra.mxu0 %v2024_v1  ;;  %823 = vmatprep.mubr.f32.mxu0 %v2025_v13 }
  0x87   :  { %1149 = vmatpush3.msra.mxu1 %v2026_v32  ;;  %825 = vmatmul.mubr.f32.vlgmr.msra.gmra.mxu0 %v2027_v61 }
  0x88   :  { %1150 = vmatprep.subr.mxu1 %v1489_v19  ;;  %927 = vmatprep.mubr.f32.mxu1 %v2025_v13 }
  0x89   :  { %1151 = vmatpush3.msra.mxu1 %v1983_v38 }
  0x8a   :  { %1152 = vmatprep.subr.mxu1 %v1985_v56 }
  0x8b   :  { %1153 = vmatpush3.msra.mxu1 %v1987_v46 }
  0x8c   :  { %1154 = vmatprep.subr.mxu1 %v1989_v7 }
  0x8d   :  { %1155 = vmatpush3.msra.mxu1 %v1555_v28 }
  0x8e   :  { %1156 = vmatprep.subr.mxu1 %v1569_v41 }
  0x8f   :  { %1157 = vmatpush3.msra.mxu1 %v1585_v24 }
  0x90   :  { %929 = vmatmul.mubr.f32.vlgmr.msra.gmra.mxu1 %v2027_v61 }
 0x105   :  { %v983_v43 = vpop.f32.mrf.mxu0 }
 0x107   :  { %v984_v19 = vpop.f32.mrf.mxu0 }
 0x108   :  { %v985_v39 = vadd.f32 %v984_v19, %v983_v43 }
 0x10d   :  { %v1018_v52 = vpop.f32.mrf.mxu1 }
 0x10f   :  { %v1019_v37 = vpop.f32.mrf.mxu1 }
 0x110   :  { %v1020_v56 = vadd.f32 %v1019_v37, %v1018_v52 }
 0x112   :  { %v413_v28 = vadd.f32 %v1020_v56, %v985_v39 }
 0x125   :  { %v1053_v36 = vpop.f32.mrf.mxu0 }
 0x127   :  { %v1054_v38 = vpop.f32.mrf.mxu0 }
 0x128   :  { %v1055_v7 = vadd.f32 %v1054_v38, %v1053_v36 }
 0x12a   :  { %v551_v41 = vadd.f32 %v1055_v7, %v413_v28 }
 0x12e   :  { %v1088_v33 = vpop.f32.mrf.mxu1 }
 0x130   :  { %v1089_v46 = vpop.f32.mrf.mxu1 }
 0x131   :  { %v1090_v29 = vadd.f32 %v1089_v46, %v1088_v33 }
 0x133   :  { %v659_v20 = vadd.f32 %v1090_v29, %v551_v41 }
 0x147   :  { %v1123_v12 = vpop.f32.mrf.mxu0 }
 0x149   :  { %v1124_v53 = vpop.f32.mrf.mxu0 }
 0x14a   :  { %v1125_v51 = vadd.f32 %v1124_v53, %v1123_v12 }
 0x14c   :  { %v827_v30 = vadd.f32 %v1125_v51, %v659_v20 }
 0x150   :  { %v1158_v24 = vpop.f32.mrf.mxu1 }
 0x152   :  { %v1159_v49 = vpop.f32.mrf.mxu1 }
 0x153   :  { %v1160_v34 = vadd.f32 %v1159_v49, %v1158_v24 }
 0x155   :  { %v931_v44 = vadd.f32 %v1160_v34, %v827_v30 }
 0x157   :  { %934 = vst [vmem:[#allocation7] sm:$0xff] %v931_v44 }
 0x158   :  { %1217 = shalt.err (!%p1214_p0)
}
 0x159   :  { %944 = dma.vmem_to_hbm [thread:$0]  %s942_s1, 128, %s1865_s2, [#allocation4]  }
 0x15a   :  { %1230 = dma.done.wait [#allocation4], 128  }
 0x15b   :  { %1231 = vsyncadd [#allocation4], 4294967168 }
 0x15c   :  { %948 = vsyncpa [#allocation3], 1 }
 0x15d   :  { %949 = vsyncpa [#allocation6], 1 }
 0x15e   :  { %950 = vsyncpa [#allocation4], 1 }

</bundles_post_ra>
